<compile_context>
chip_gen: v5e
topology: v5e:2x2
jax: 0.10.0
libtpu: 0.0.40
codegen_flags: <defaults>
</compile_context>

<pallas_src>
import jax
import jax.numpy as jnp
from jax.experimental import pallas as pl
from jax.experimental.pallas import tpu as pltpu


def _round_up(x, m):
    return (x + m - 1) // m * m


def lookup_gating_kernel(x_ref, ids_ref, ms_ref, gv_ref, gb_ref, out_ref):
    x = x_ref[...].astype(jnp.float32)        # (TM, TD)
    ids = ids_ref[...]                        # (TM, 1) int32
    ms = ms_ref[...].astype(jnp.float32)      # (TM, 1)
    gv = gv_ref[...]                          # (P, TD)  native dtype
    gb = gb_ref[...].astype(jnp.float32)      # (1, P)

    tm = x_ref.shape[0]
    p = gv_ref.shape[0]

    # one-hot(pattern_ids): exact 0/1 row selector
    onehot_bool = jax.lax.broadcasted_iota(jnp.int32, (tm, p), 1) == ids

    # row gather via one-hot matmul (MXU), f32 accumulation
    gates = jnp.dot(onehot_bool.astype(gv.dtype), gv,
                    preferred_element_type=jnp.float32)          # (TM, TD)

    # bias gather: VPU mul + lane reduce (avoid a width-1 MXU matmul)
    bias = jnp.sum(onehot_bool.astype(jnp.float32) * gb,
                   axis=-1, keepdims=True)                       # (TM, 1)

    gate_weights = jax.nn.sigmoid(gates * x + bias)              # (TM, TD)
    gate_weights = gate_weights * ms                             # broadcast over D
    out_ref[...] = (x * gate_weights).astype(out_ref.dtype)


def _pick_tiles(n_rows, d_model, x_dtype, gv_dtype, n_patterns):
    """Pick (tm, td, d_pad) under a ~32 MiB VMEM budget (fits all generations)."""
    xb = jnp.dtype(x_dtype).itemsize
    gvb = jnp.dtype(gv_dtype).itemsize

    d_pad = _round_up(d_model, 128)
    # D tile: cap it, and shrink further if the resident gate table would be big.
    td = min(d_pad, 2048)
    while td > 128 and 2 * n_patterns * td * gvb > (8 << 20):
        td -= 128
    d_pad = _round_up(d_pad, td)

    budget = 32 << 20
    fixed = (2 * n_patterns * td * gvb                 # gv double buffer
             + 2 * 8 * _round_up(n_patterns, 128) * 4  # gb (lane/sublane padded)
             + (1 << 20))                              # slack
    # per row: x + out double-buffered, ids + ms padded to 128 lanes, 2 buffers each
    per_row = 2 * td * xb + 2 * td * xb + 2 * 2 * 128 * 4
    tm = (max(budget - fixed, 8 * per_row) // per_row) // 8 * 8
    tm = int(max(8, min(tm, 1024)))

    # keep at least 2 row blocks when possible (v7x has 2 TensorCores per chip)
    if n_rows >= 16:
        tm = min(tm, max(8, (n_rows // 2) // 8 * 8))
    return tm, td, d_pad


def lookup_gating(x, pattern_ids, match_scores, gate_vectors, gate_bias):
    """x: (B, S, D); pattern_ids: (B, S) int; match_scores: (B, S) float."""
    B, S, D = x.shape
    P, Dg = gate_vectors.shape
    assert Dg == D
    N = B * S

    tm, td, d_pad = _pick_tiles(N, D, x.dtype, gate_vectors.dtype, P)
    n_pad = _round_up(N, tm)

    # native-dtype I/O (no forced f32 round-trip through HBM)
    x2 = x.reshape(N, D)
    ids2 = pattern_ids.reshape(N, 1).astype(jnp.int32)
    ms2 = match_scores.reshape(N, 1).astype(jnp.float32)
    gv = gate_vectors
    gb = gate_bias.reshape(1, P).astype(jnp.float32)

    if d_pad != D:
        x2 = jnp.pad(x2, ((0, 0), (0, d_pad - D)))
        gv = jnp.pad(gv, ((0, 0), (0, d_pad - D)))
    if n_pad != N:
        x2 = jnp.pad(x2, ((0, n_pad - N), (0, 0)))
        ids2 = jnp.pad(ids2, ((0, n_pad - N), (0, 0)))   # id 0 is a valid pattern
        ms2 = jnp.pad(ms2, ((0, n_pad - N), (0, 0)))

    # D blocks on the OUTER axis so the gv block stays put across the inner
    # row loop (Pallas skips the DMA when the block index is unchanged).
    grid = (d_pad // td, n_pad // tm)

    out = pl.pallas_call(
        lookup_gating_kernel,
        out_shape=jax.ShapeDtypeStruct((n_pad, d_pad), x.dtype),
        grid_spec=pltpu.PrefetchScalarGridSpec(
            num_scalar_prefetch=0,
            grid=grid,
            in_specs=[
                pl.BlockSpec((tm, td), lambda di, ri: (ri, di)),   # x rows
                pl.BlockSpec((tm, 1), lambda di, ri: (ri, 0)),     # pattern ids
                pl.BlockSpec((tm, 1), lambda di, ri: (ri, 0)),     # match scores
                pl.BlockSpec((P, td), lambda di, ri: (0, di)),     # gate_vectors D-block
                pl.BlockSpec((1, P), lambda di, ri: (0, 0)),       # gate_bias row
            ],
            out_specs=pl.BlockSpec((tm, td), lambda di, ri: (ri, di)),
        ),
        compiler_params=pltpu.CompilerParams(
            dimension_semantics=("parallel", "parallel"),
            vmem_limit_bytes=48 << 20,
        ),
    )(x2, ids2, ms2, gv, gb)

    return out[:N, :D].reshape(B, S, D)


def lookup_gating_ref(x, pattern_ids, match_scores, gate_vectors, gate_bias):
    gates = gate_vectors[pattern_ids]                      # (B, S, D)
    bias = gate_bias[pattern_ids][..., None]               # (B, S, 1)
    gw = jax.nn.sigmoid(gates * x + bias)
    gw = gw * match_scores[..., None]
    return x * gw


if __name__ == "__main__":
    B, S, D, P = 2, 8, 32, 4
    key = jax.random.PRNGKey(0)
    k_x, k_gv, k_ids, k_ms = jax.random.split(key, 4)

    # deterministic "parameters" (matching torch.randn / torch.zeros init)
    gate_vectors = jax.random.normal(k_gv, (P, D), dtype=jnp.float32)
    gate_bias = jnp.zeros((P,), dtype=jnp.float32)

    # example inputs
    x = jax.random.normal(k_x, (B, S, D), dtype=jnp.float32)
    pattern_ids = jax.random.randint(k_ids, (B, S), 0, P, dtype=jnp.int32)
    match_scores = jax.random.uniform(k_ms, (B, S), dtype=jnp.float32)

    # f32 path: exact check vs reference
    out = lookup_gating(x, pattern_ids, match_scores, gate_vectors, gate_bias)
    out = jax.block_until_ready(out)
    ref = lookup_gating_ref(x, pattern_ids, match_scores, gate_vectors, gate_bias)
    assert out.shape == (B, S, D)
    assert out.dtype == x.dtype
    assert jnp.allclose(out, ref, atol=1e-5, rtol=1e-5), "mismatch vs reference (f32)"

    # bf16 I/O path: kernel keeps HBM traffic in bf16, math in f32 in-kernel
    x_bf = x.astype(jnp.bfloat16)
    out_bf = lookup_gating(x_bf, pattern_ids, match_scores,
                           gate_vectors.astype(jnp.bfloat16), gate_bias)
    out_bf = jax.block_until_ready(out_bf)
    assert out_bf.dtype == jnp.bfloat16
    assert jnp.allclose(out_bf.astype(jnp.float32), ref, atol=1e-1, rtol=1e-1), \
        "mismatch vs reference (bf16 I/O)"

    print("KERNEL_OK")
</pallas_src>

<mosaic_0001>
module attributes {stable_mosaic.version = 11 : i64} {
  func.func @lookup_gating_kernel(%arg0: i32, %arg1: i32, %arg2: memref<8x128xf32, #tpu.memory_space<vmem>>, %arg3: memref<8x1xi32, #tpu.memory_space<vmem>>, %arg4: memref<8x1xf32, #tpu.memory_space<vmem>>, %arg5: memref<4x128xf32, #tpu.memory_space<vmem>>, %arg6: memref<1x4xf32, #tpu.memory_space<vmem>>, %arg7: memref<8x128xf32, #tpu.memory_space<vmem>>) attributes {dimension_semantics = [#tpu.dimension_semantics<parallel>, #tpu.dimension_semantics<parallel>], iteration_bounds = array<i64: 1, 2>, scalar_prefetch = 0 : i64, scratch_operands = 0 : i64, tpu.core_type = #tpu.core_type<tc>, window_params = [{transform_indices = @transform_0, window_bounds = array<i64: 8, 128>}, {transform_indices = @transform_1, window_bounds = array<i64: 8, 1>}, {transform_indices = @transform_2, window_bounds = array<i64: 8, 1>}, {transform_indices = @transform_3, window_bounds = array<i64: 4, 128>}, {pipeline_mode = #tpu.pipeline_mode<synchronous>, transform_indices = @transform_4, window_bounds = array<i64: 1, 4>}, {transform_indices = @transform_5, window_bounds = array<i64: 8, 128>}]} {
    %c0 = arith.constant 0 : index
    %c0_0 = arith.constant 0 : index
    %0 = vector.load %arg2[%c0, %c0_0] : memref<8x128xf32, #tpu.memory_space<vmem>>, vector<8x128xf32>
    %c0_1 = arith.constant 0 : index
    %c0_2 = arith.constant 0 : index
    %1 = vector.load %arg3[%c0_1, %c0_2] : memref<8x1xi32, #tpu.memory_space<vmem>>, vector<8x1xi32>
    %c0_3 = arith.constant 0 : index
    %c0_4 = arith.constant 0 : index
    %2 = vector.load %arg4[%c0_3, %c0_4] : memref<8x1xf32, #tpu.memory_space<vmem>>, vector<8x1xf32>
    %c0_5 = arith.constant 0 : index
    %c0_6 = arith.constant 0 : index
    %3 = vector.load %arg5[%c0_5, %c0_6] : memref<4x128xf32, #tpu.memory_space<vmem>>, vector<4x128xf32>
    %c0_7 = arith.constant 0 : index
    %c0_8 = arith.constant 0 : index
    %4 = vector.load %arg6[%c0_7, %c0_8] : memref<1x4xf32, #tpu.memory_space<vmem>>, vector<1x4xf32>
    %5 = tpu.iota {dimensions = array<i32: 1>} : vector<8x4xi32>
    %6 = vector.broadcast %1 : vector<8x1xi32> to vector<8x4xi32>
    %7 = arith.cmpi eq, %5, %6 : vector<8x4xi32>
    %8 = arith.extui %7 : vector<8x4xi1> to vector<8x4xi32>
    %9 = arith.sitofp %8 : vector<8x4xi32> to vector<8x4xf32>
    %cst = arith.constant dense<0.000000e+00> : vector<8x128xf32>
    %10 = tpu.matmul %9, %3, %cst {dimension_numbers = #tpu.dot_dimension_numbers<[1], [0], [0], [1], [0, 0, 1, 1], [], []>} : vector<8x4xf32>, vector<4x128xf32>, vector<8x128xf32> -> vector<8x128xf32>
    %11 = arith.extui %7 : vector<8x4xi1> to vector<8x4xi32>
    %12 = arith.sitofp %11 : vector<8x4xi32> to vector<8x4xf32>
    %13 = vector.broadcast %4 : vector<1x4xf32> to vector<8x4xf32>
    %14 = arith.mulf %12, %13 : vector<8x4xf32>
    %cst_9 = arith.constant dense<0.000000e+00> : vector<8xf32>
    %15 = vector.multi_reduction <add>, %14, %cst_9 [1] : vector<8x4xf32> to vector<8xf32>
    %16 = vector.shape_cast %15 : vector<8xf32> to vector<8x1xf32>
    %17 = arith.mulf %10, %0 : vector<8x128xf32>
    %18 = vector.broadcast %16 : vector<8x1xf32> to vector<8x128xf32>
    %19 = arith.addf %17, %18 : vector<8x128xf32>
    %20 = arith.negf %19 : vector<8x128xf32>
    %21 = math.exp %20 : vector<8x128xf32>
    %cst_10 = arith.constant 1.000000e+00 : f32
    %22 = vector.broadcast %cst_10 : f32 to vector<8x128xf32>
    %23 = arith.addf %22, %21 : vector<8x128xf32>
    %24 = arith.divf %22, %23 : vector<8x128xf32>
    %25 = vector.broadcast %2 : vector<8x1xf32> to vector<8x128xf32>
    %26 = arith.mulf %24, %25 : vector<8x128xf32>
    %27 = arith.mulf %0, %26 : vector<8x128xf32>
    %c0_11 = arith.constant 0 : index
    %c0_12 = arith.constant 0 : index
    %28 = vector.load %arg7[%c0_11, %c0_12] : memref<8x128xf32, #tpu.memory_space<vmem>>, vector<8x128xf32>
    tpu.vector_store %arg7[%c0_11, %c0_12], %27 {strides = array<i32>} : memref<8x128xf32, #tpu.memory_space<vmem>>, vector<8x128xf32>,
    return
  }
  func.func @transform_0(%arg0: i32, %arg1: i32) -> (i32, i32) {
    %c0_i32 = arith.constant 0 : i32
    return %arg1, %arg0 : i32, i32
  }
  func.func @transform_1(%arg0: i32, %arg1: i32) -> (i32, i32) {
    %c0_i32 = arith.constant 0 : i32
    %c0_i32_0 = arith.constant 0 : i32
    return %arg1, %c0_i32 : i32, i32
  }
  func.func @transform_2(%arg0: i32, %arg1: i32) -> (i32, i32) {
    %c0_i32 = arith.constant 0 : i32
    %c0_i32_0 = arith.constant 0 : i32
    return %arg1, %c0_i32 : i32, i32
  }
  func.func @transform_3(%arg0: i32, %arg1: i32) -> (i32, i32) {
    %c0_i32 = arith.constant 0 : i32
    %c0_i32_0 = arith.constant 0 : i32
    return %c0_i32, %arg0 : i32, i32
  }
  func.func @transform_4(%arg0: i32, %arg1: i32) -> (i32, i32) {
    %c0_i32 = arith.constant 0 : i32
    %c0_i32_0 = arith.constant 0 : i32
    %c0_i32_1 = arith.constant 0 : i32
    return %c0_i32, %c0_i32_0 : i32, i32
  }
  func.func @transform_5(%arg0: i32, %arg1: i32) -> (i32, i32) {
    %c0_i32 = arith.constant 0 : i32
    return %arg1, %arg0 : i32, i32
  }
}

</mosaic_0001>

<bundles_post_ra>
// kernel: tpu_custom_call.1
= control target key start
LH: loop header
LB: loop body
LE: loop exit
PB: predicated region body
PF: predicated region fallthrough
CT: control target
= control target key end

     0   :  { %10 = vsyncpa [#allocation3], 0  ;;  %s803_s0 = inlined_call_operand.vmem [shape: f32[16,128], index: 0, kind: input, shape index: {}]   ;;  %s804_s1 = inlined_call_operand.vmem [shape: s32[16,1], index: 1, kind: input, shape index: {}]   ;;  %s805_s2 = inlined_call_operand.vmem [shape: f32[16,1], index: 2, kind: input, shape index: {}]   ;;  %s806_s3 = inlined_call_operand.vmem [shape: f32[4,128], index: 3, kind: input, shape index: {}]   ;;  %s807_s4 = inlined_call_operand.vmem [shape: f32[1,4], index: 4, kind: input, shape index: {}]   ;;  %s808_s5 = inlined_call_operand.hbm [shape: f32[16,128], index: 5, kind: output, shape index: {}]  }
   0x1   :  { %12 = vsyncpa [#allocation3 + $0x1], 0  ;;  %s694_s18 = smov 0   ;;  %s696_s19 = smov 0  }
   0x2   :  { %s698_s20 = smov 0   ;;  %s700_s21 = smov 0  }
   0x3   :  { %s702_s22 = smov 0   ;;  %s704_s23 = smov 0  }
   0x4 LB: > { %s500_s24 = sadd.s32 4294967295, %s660_s23   ;;  %s501_s25 = sadd.s32 4294967294, %s660_s23   ;;  %s660_s23 = sphi %s704_s23, %s18_s23   ;;  %s656_s22 = sphi %s702_s22, %s815_s22   ;;  %s652_s21 = sphi %s700_s21, %s814_s21   ;;  %s648_s20 = sphi %s698_s20, %s813_s20   ;;  %s644_s19 = sphi %s696_s19, %s812_s19   ;;  %s640_s18 = sphi %s694_s18, %s811_s18  }
   0x5   : > { %s27_s26 = sadd.s32 1, %s656_s22  ;;  %s166_s27 = sadd.s32 1, %s648_s20 }
   0x6   : > { %p28_p0 = scmp.ge.s32.totalorder %s27_s26, 2  ;;  %p176_p1 = scmp.ne.s32.totalorder %s648_s20, %s644_s19 }
   0x7   : > { %p177_p2 = scmp.eq.s32.totalorder %s500_s24, 1  ;;  %p182_p3 = scmp.ne.s32.totalorder %s644_s19, %s640_s18 }
   0x8   : > { %s817_s26 = smov (%p28_p0, %s27_s26), 0  ;;  %p183_p5 = scmp.eq.s32.totalorder %s501_s25, 1 }
   0x9   : > { %p734_p4 = por %p177_p2, %p176_p1  ;;  %s161_s29 = ssub.s32 %s656_s22, %s817_s26 }
   0xa   : > { %p505_p6 = scmp.ge.s32.totalorder %s660_s23, 1  ;;  %p164_p7 = scmp.eq.s32.totalorder %s161_s29, 0 }
   0xb   : > { %p741_p8 = por %p183_p5, %p182_p3  ;;  %p235_p9 = scmp.lt.s32.totalorder %s660_s23, 3 }
   0xc   : > { %s747_s6 = scalar_select %p164_p7, %s648_s20, %s166_s27  }
   0xd   : > { %p236_p10 = pnand %p505_p6, %p235_p9 }
   0xe   : > { %p277_p11 = scmp.lt.s32.totalorder (!%p236_p10), %s652_s21, 1  ;;  %s515_s10 = sshll.u32 (!%p236_p10), %s652_s21, 3 }
   0xf   : > { %239 = sbr.rel (%p236_p10) target bundleno = 307 (0x133), region = 40  ;;  %s385_s12 = scalar_lea.hbm (!%p236_p10), %s808_s5, %s515_s10 }
  0x10   : > { %s389_s15 = sshll.u32 (!%p236_p10), %s385_s12, 4  ;;  %s602_s27 = scalar_lea.hbm (!%p236_p10), %s808_s5, 16  ;;  %s390_s15 = int_to_ptr.hbm [resolvable:$true] %s389_s15 }
  0x14   : > { %v662_v0 = vmov 0   ;;  %s278_s7 = scalar_select %p277_p11, %s652_s21, 1  ;;  %v299_v2 = vld [vmem:[%s806_s3] sm:$0xf]  ;;  %vm313_vm0 = vcmask 1043456   ;;  %v301_v4 = vlaneseq  ;;  %vm309_vm1 = vcmask 31744  }
  0x15   : > { %575 = vset.pattern.permute.xlu0 %v662_v0  ;;  %576 = vset.pattern.permute.xlu1 %v662_v0  ;;  %v577_v6 = vld [vmem:[%s807_s4] ss:$0 sm:$0xff]  ;;  %v663_v8 = vmov 0.0  }
  0x16   : > { %s507_s8 = sshll.u32 %s278_s7, 3  ;;  %511 = vmatpush.msk.msra.mxu0 %vm313_vm0, %v299_v2  ;;  %v302_v5 = vand.u32 127, %v301_v4  ;;  %s274_s7 = sand.u32 1, %s644_s19  }
  0x17   : > { %s287_s11 = scalar_lea.vmem %s804_s1, %s507_s8  ;;  %s291_s16 = scalar_lea.vmem %s805_s2, %s507_s8 }
  0x18   : > { %v297_v1 = vld [vmem:[%s287_s11] sm:$0xff]  ;;  %s283_s29 = scalar_lea.vmem %s803_s0, %s507_s8  ;;  %s506_s9 = sshll.u32 %s274_s7, 3 }
  0x19   : > { %304 = vperm.xlu0 %575, %v297_v1   ;;  %v298_v3 = vld [vmem:[%s291_s16] sm:$0xff]  ;;  %s276_s13 = scalar_lea.vmem [#allocation2], %s506_s9  ;;  %s374_s21 = scalar_lea.sflag [#allocation3], %s274_s7 }
  0x1a   : > { %367 = vperm.xlu1 %576, %v298_v3   ;;  %v296_v12 = vld [vmem:[%s283_s29] sm:$0xff]  ;;  %s387_s14 = sshll.u32 %s276_s13, 4  ;;  %s596_s16 = sshra.s32 %s390_s15, 4  ;;  %s388_s14 = int_to_ptr.vmem [resolvable:$true] %s387_s14  ;;  %s597_s16 = int_to_ptr.hbm [resolvable:$true] %s596_s16 }
  0x1b   : > { %s598_s17 = scalar_lea.hbm %s597_s16, 8  ;;  %p603_p1 = scmp.lt.s32.totalorder %s597_s16, %s808_s5 }
  0x1c   : > { %p599_p12 = scmp.ne.s32.totalorder %s597_s16, %s598_s17  ;;  %p604_p2 = scmp.lt.s32.totalorder %s602_s27, %s598_s17 }
  0x1e   : > { %p600_p13 = pnand %p599_p12, %p734_p4  ;;  %p605_p3 = por %p604_p2, %p603_p1 }
  0x20   : > { %p601_p0 = pneg %p600_p13 }
  0x22   : > { %p606_p5 = pnand %p605_p3, %p601_p0 }
  0x8b   : > { %v305_v7 = vpop.permute.xlu0 %304 }
  0x8c   : > { %vm306_vm2 = vcmp.eq.s32.totalorder %v302_v5, %v305_v7  ;;  %v368_v27 = vpop.permute.xlu1 %367 }
  0x8d   : > { %v510_v9 = vsel %vm306_vm2, 1.0, %v663_v8 }
  0x8e   : > { %512 = vmatmul.msk.f32.vlgmr.msra.gmra.mxu0 %vm309_vm1, %v510_v9  ;;  %v340_v10 = vmul.f32 %v577_v6, %v510_v9 }
  0x90   : > { %v341_v11 = vsel %vm309_vm1, %v340_v10, 0.0 }
  0x91   : > { %342 = vadd.xlane.f32.xlu0 %v341_v11 }
 0x104   : > { %v343_v15 = vpop.xlane.xlu0 %342 }
 0x10b   : > { %v334_v13 = vpop.f32.mrf.mxu0 }
 0x10c   : > { %v344_v14 = vmul.f32 %v334_v13, %v296_v12 }
 0x10e   : > { %v345_v16 = vadd.f32 %v344_v14, %v343_v15 }
 0x110   : > { %v513_v17 = vmul.f32 -1.442695, %v345_v16 }
 0x112   : > { %578 = vpow2.f32 %v513_v17 }
 0x118   : > { %v579_v18 = vpop.eup %578 }
 0x119   : > { %v349_v19 = vadd.f32 1.0, %v579_v18 }
 0x11b   : > { %580 = vrcp.f32 %v349_v19  ;;  %v361_v23 = vand.u32 2147483648, %v349_v19  ;;  %v359_v25 = vand.u32 2147483647, %v349_v19  ;;  %vm355_vm4 = vweird.f32 %v349_v19 }
 0x11d   : > { %v362_v28 = vor.u32 1.1754944e-38, %v361_v23  ;;  %vm360_vm6 = vcmp.eq.f32.partialorder %v359_v25, 8.507059e+37 }
 0x121   : > { %v581_v20 = vpop.eup %580 }
 0x122   : > { %v351_v21 = vmul.f32 %v581_v20, %v349_v19  ;;  %vm356_vm3 = vweird.f32 %v581_v20 }
 0x123   : > { %vm357_vm5 = vmor %vm355_vm4, %vm356_vm3 }
 0x124   : > { %v352_v22 = vsub.f32 1.0, %v351_v21 }
 0x126   : > { %v353_v24 = vmul.f32 %v581_v20, %v352_v22 }
 0x128   : > { %v354_v26 = vadd.f32 %v581_v20, %v353_v24 }
 0x12a   : > { %v358_v29 = vsel %vm357_vm5, %v581_v20, %v354_v26 }
 0x12b   : > { %v363_v30 = vsel %vm360_vm6, %v362_v28, %v358_v29 }
 0x12c   : > { %v370_v31 = vmul.f32 %v368_v27, %v363_v30 }
 0x12e   : > { %v371_v32 = vmul.f32 %v370_v31, %v296_v12 }
 0x130   : > { %372 = vst [vmem:[%s276_s13] sm:$0xff] %v371_v32 }
 0x131   : > { %609 = shalt.err (!%p606_p5)
}
 0x132   : > { %518 = dma.vmem_to_hbm [thread:$0]  (%p734_p4), %s388_s14, 128, %s390_s15, %s374_s21  }
 0x133 PF: > { %p524_p6 = scmp.ge.s32.totalorder %s660_s23, 2  ;;  %s401_s7 = sand.u32 1, %s640_s18  }
 0x134   : > { %s402_s10 = scalar_lea.sflag [#allocation3], %s401_s7 }
 0x135   : > { %p521_p7 = pnand %p524_p6, %p741_p8 }
 0x137   : > { %p522_p9 = pneg %p521_p7 }
 0x139   : > { %635 = dma.done.wait (%p522_p9), %s402_s10, 128  }
 0x13a   : > { %637 = vsyncadd (%p522_p9), %s402_s10, 4294967168  ;;  %s18_s23 = sadd.s32 1, %s660_s23   ;;  %s811_s18 = smov %s644_s19 }
 0x13b   : > { %p15_p10 = scmp.ge.s32.totalorder %s18_s23, 4   ;;  %s812_s19 = smov %s648_s20 }
 0x13c   : > { %s813_s20 = smov %s747_s6  ;;  %s814_s21 = smov %s656_s22 }
 0x13d   : > { %s815_s22 = smov %s817_s26  ;;  %17 = sbr.rel (!%p15_p10) target bundleno = 4 (0x4), region = 84 }
 0x142   :  { %408 = vsyncpa [#allocation3], 1 }
 0x143   :  { %410 = vsyncpa [#allocation3 + $0x1], 1 }

</bundles_post_ra>
